<compile_context>
chip_gen: v5e
topology: v5e:2x2
jax: 0.10.0
libtpu: 0.0.40
codegen_flags: <defaults>
</compile_context>

<pallas_src>
from functools import partial

import numpy as np
import jax
import jax.numpy as jnp
from jax.experimental import pallas as pl
from jax.experimental.pallas import tpu as pltpu

MAX_DISTANCE = 8            # synthetic device.max_distance
HIDDEN = 32
IN_FEATURES = 2 * MAX_DISTANCE
N_MODELS = 2                # 0: current_model, 1: target_model


def _round_up(x, m):
    return ((x + m - 1) // m) * m


# ----------------------------------------------------------------------------
# Pallas kernel: fused 4-layer MLP for both models, feature-major layout.
#   xc, xn : (D, TB)        current / next distance vectors, batch on lanes
#   w1a/w1b: (2H, D)        first layer, both models stacked on the row axis
#   w2, w3 : (2H, 2H)       block-diagonal hidden layers (cur | tgt)
#   w4     : (2, 2H)        output layer, row m reads only model m's hidden block
#   b*     : (rows, 1)      biases, broadcast over lanes
#   o      : (2, TB)        row 0 = q_current^T, row 1 = q_target^T  (lane-dense store)
# ----------------------------------------------------------------------------
def _dqn_kernel(xc_ref, xn_ref, w1a_ref, w1b_ref, b1_ref, w2_ref, b2_ref,
                w3_ref, b3_ref, w4_ref, b4_ref, o_ref):
    xc = xc_ref[...]                                   # (D, TB)
    xn = xn_ref[...]                                   # (D, TB)
    h = (jnp.dot(w1a_ref[...], xc, preferred_element_type=jnp.float32)
         + jnp.dot(w1b_ref[...], xn, preferred_element_type=jnp.float32)
         + b1_ref[...])
    h = jnp.maximum(h, 0.0)                            # (2H, TB)
    h = jnp.maximum(
        jnp.dot(w2_ref[...], h, preferred_element_type=jnp.float32) + b2_ref[...], 0.0)
    h = jnp.maximum(
        jnp.dot(w3_ref[...], h, preferred_element_type=jnp.float32) + b3_ref[...], 0.0)
    o_ref[...] = (jnp.dot(w4_ref[...], h, preferred_element_type=jnp.float32)
                  + b4_ref[...])                       # (2, TB) single lane-dense store


# ----------------------------------------------------------------------------
# Tile picking: TB is a multiple of 128 that divides B_pad; when the padded
# batch allows it we guarantee >= 2 grid blocks so v7x's two TensorCores can
# split the "parallel" batch axis (no-op on v5e/v6e).
# ----------------------------------------------------------------------------
def _pick_tb(b_pad, block_b):
    assert b_pad % 128 == 0
    tb = min(_round_up(block_b, 128), b_pad)
    if b_pad > 128 and b_pad // tb < 2:
        tb = _round_up(-(-b_pad // 2), 128)
    while b_pad % tb != 0:
        tb -= 128
    return tb


# ----------------------------------------------------------------------------
# Core pallas_call wrapper (prepared, feature-major inputs).
# ----------------------------------------------------------------------------
def _dqn_pallas(xc_t, xn_t, fused_params, block_b=2048):
    """xc_t/xn_t: (D, B_pad) f32, B_pad % 128 == 0. Returns (N_MODELS, B_pad) f32."""
    D, b_pad = xc_t.shape
    tb = _pick_tb(b_pad, block_b)
    num_blocks = b_pad // tb

    x_spec = pl.BlockSpec((D, tb), lambda i: (0, i))
    # Full-array blocks, constant index_map: weights loaded once, VMEM-resident.
    param_specs = [pl.BlockSpec(p.shape, lambda i, nd=p.ndim: (0,) * nd)
                   for p in fused_params]

    return pl.pallas_call(
        _dqn_kernel,
        out_shape=jax.ShapeDtypeStruct((N_MODELS, b_pad), jnp.float32),
        grid=(num_blocks,),
        in_specs=[x_spec, x_spec] + param_specs,
        out_specs=pl.BlockSpec((N_MODELS, tb), lambda i: (0, i)),
        compiler_params=pltpu.CompilerParams(
            dimension_semantics=("parallel",)),   # v7x: shard batch blocks over both TCs
    )(xc_t, xn_t, *fused_params)


# Fast path: inputs already in (D, B_pad) layout (build them once at replay-buffer time).
dqn_apply_prepared = jax.jit(_dqn_pallas, static_argnames=("block_b",))


def prepare_inputs(x_cur, x_nxt):
    """Host-side, one-time: (B, D) -> (D, B_pad) f32, B_pad = round_up(B, 128)."""
    x_cur = np.asarray(x_cur, np.float32)
    x_nxt = np.asarray(x_nxt, np.float32)
    B, D = x_cur.shape
    b_pad = _round_up(B, 128)
    xc = np.zeros((D, b_pad), np.float32)
    xn = np.zeros((D, b_pad), np.float32)
    xc[:, :B] = x_cur.T
    xn[:, :B] = x_nxt.T
    return jnp.asarray(xc), jnp.asarray(xn)


# Convenience path: accepts (B, D) row-major vectors like the torch module would see.
@partial(jax.jit, static_argnames=("block_b",))
def dqn_apply(x_cur, x_nxt, fused_params, block_b=2048):
    """x_cur/x_nxt: (B, D) f32. Returns (B, N_MODELS) f32 Q-values."""
    B, D = x_cur.shape
    b_pad = _round_up(B, 128)
    # TODO(synk): for large replay batches build inputs directly in (D, B_pad) layout
    # (prepare_inputs) and call dqn_apply_prepared to avoid this transpose+pad copy.
    xc_t = jnp.zeros((D, b_pad), jnp.float32).at[:, :B].set(x_cur.T)
    xn_t = jnp.zeros((D, b_pad), jnp.float32).at[:, :B].set(x_nxt.T)
    q = _dqn_pallas(xc_t, xn_t, fused_params, block_b)   # (2, B_pad)
    return q[:, :B].T                                    # (B, 2)


# ----------------------------------------------------------------------------
# Parameter init (mimics torch.nn.Linear default init U(-1/sqrt(fan_in), ...)),
# kept in the natural (in, out) layout; fusion/transposition happens in _fuse.
# ----------------------------------------------------------------------------
def init_mlp_params(key):
    dims = [(IN_FEATURES, HIDDEN), (HIDDEN, HIDDEN), (HIDDEN, HIDDEN), (HIDDEN, 1)]
    params = []
    for (fan_in, fan_out) in dims:
        key, kw, kb = jax.random.split(key, 3)
        bound = 1.0 / np.sqrt(fan_in)
        w = jax.random.uniform(kw, (fan_in, fan_out), jnp.float32, -bound, bound)
        b = jax.random.uniform(kb, (fan_out,), jnp.float32, -bound, bound)
        params += [w, b]
    return key, tuple(params)


def _fuse(cur, tgt):
    """Fuse current/target params into one transposed, block-diagonal set."""
    (w1c, b1c, w2c, b2c, w3c, b3c, w4c, b4c) = cur
    (w1t, b1t, w2t, b2t, w3t, b3t, w4t, b4t) = tgt
    D, H = MAX_DISTANCE, HIDDEN
    z = jnp.zeros((H, H), jnp.float32)

    w1a = jnp.concatenate([w1c[:D].T, w1t[:D].T], axis=0)        # (2H, D)
    w1b = jnp.concatenate([w1c[D:].T, w1t[D:].T], axis=0)        # (2H, D)
    b1 = jnp.concatenate([b1c, b1t]).reshape(2 * H, 1)
    w2 = jnp.block([[w2c.T, z], [z, w2t.T]])                     # (2H, 2H) block-diag
    b2 = jnp.concatenate([b2c, b2t]).reshape(2 * H, 1)
    w3 = jnp.block([[w3c.T, z], [z, w3t.T]])
    b3 = jnp.concatenate([b3c, b3t]).reshape(2 * H, 1)
    w4 = jnp.concatenate(
        [jnp.concatenate([w4c.T, jnp.zeros((1, H), jnp.float32)], axis=1),
         jnp.concatenate([jnp.zeros((1, H), jnp.float32), w4t.T], axis=1)],
        axis=0)                                                  # (2, 2H)
    b4 = jnp.concatenate([b4c, b4t]).reshape(2, 1)
    return (w1a, w1b, b1, w2, b2, w3, b3, w4, b4)


def ref_mlp(xc, xn, params):
    """Pure-JAX reference of one model, mirrors the torch Sequential exactly."""
    w1, b1, w2, b2, w3, b3, w4, b4 = params
    x = jnp.concatenate([xc, xn], axis=-1)
    h = jnp.maximum(x @ w1 + b1, 0.0)
    h = jnp.maximum(h @ w2 + b2, 0.0)
    h = jnp.maximum(h @ w3 + b3, 0.0)
    return h @ w4 + b4


# ----------------------------------------------------------------------------
# Host-side glue: distance-metric preprocessing, vectorized with numpy.
# TODO(synk): the real CircuitStateDQN / DeviceTopology state walk (and act/replay/
#             simulated annealing) stays on host; only the MLP hot path runs on TPU.
# ----------------------------------------------------------------------------
def get_distance_metric(node_to_qubit, qubit_targets, distances, max_distance):
    node_to_qubit = np.asarray(node_to_qubit)
    qubit_targets = np.asarray(qubit_targets)
    n = node_to_qubit.shape[0]
    qubit_to_node = np.empty(n, dtype=np.int64)            # inverse permutation
    qubit_to_node[node_to_qubit] = np.arange(n)
    target_qubits = qubit_targets[node_to_qubit]            # per node
    valid = target_qubits >= 0
    target_nodes = qubit_to_node[np.clip(target_qubits, 0, n - 1)]
    d = distances[np.arange(n), np.where(valid, target_nodes, 0)].astype(np.int64)
    vec = np.zeros(max_distance, dtype=np.float32)
    # matches original semantics, including the d==0 -> vec[-1] negative-index quirk
    np.add.at(vec, d[valid] - 1, 1.0)
    return vec


# ----------------------------------------------------------------------------
# Agent wrapper: one fused kernel call evaluates both models.
# ----------------------------------------------------------------------------
class DoubleDQNAgentPallas:
    """Pallas port of DoubleDQNAgent.forward (current_model / target_model MLPs)."""

    def __init__(self, key):
        key, self.current_params = init_mlp_params(key)
        # Standard Double DQN: target network starts as a copy of the online network.
        self.target_params = self.current_params
        self._refuse()

    def _refuse(self):
        self._fused = _fuse(self.current_params, self.target_params)

    def update_target_model(self):
        self.target_params = self.current_params
        self._refuse()

    def forward_both(self, current_distance_vec, next_distance_vec):
        """Single fused pallas_call -> (q_current, q_target), each (B, 1)."""
        q = dqn_apply(current_distance_vec, next_distance_vec, self._fused)
        return q[:, 0:1], q[:, 1:2]

    def forward(self, current_distance_vec, next_distance_vec, action_chooser="model"):
        q = dqn_apply(current_distance_vec, next_distance_vec, self._fused)
        if action_chooser == "model":
            return q[:, 0:1]
        elif action_chooser == "target":
            return q[:, 1:2]
        else:
            raise ValueError("Action_chooser must be either model or target")


# ----------------------------------------------------------------------------
# Main
# ----------------------------------------------------------------------------
if __name__ == "__main__":
    key = jax.random.PRNGKey(0)
    agent = DoubleDQNAgentPallas(key)

    # Synthetic device: 8 nodes on a ring; distances = ring hop count.
    n_nodes = MAX_DISTANCE
    rng = np.random.RandomState(0)
    distances = np.zeros((n_nodes, n_nodes), dtype=np.int32)
    for i in range(n_nodes):
        for j in range(n_nodes):
            d = abs(i - j)
            distances[i, j] = min(d, n_nodes - d)

    # Batch of synthetic (current_state, next_state) pairs -> distance vectors.
    B = 8
    cur_list, nxt_list = [], []
    for _ in range(B):
        node_to_qubit = rng.permutation(n_nodes)
        qubit_targets = rng.randint(-1, n_nodes, size=n_nodes)  # -1 => no target
        cur_list.append(get_distance_metric(node_to_qubit, qubit_targets,
                                            distances, MAX_DISTANCE))
        node_to_qubit2 = rng.permutation(n_nodes)
        nxt_list.append(get_distance_metric(node_to_qubit2, qubit_targets,
                                            distances, MAX_DISTANCE))
    current_dist = jnp.asarray(np.stack(cur_list))   # (B, MAX_DISTANCE)
    next_dist = jnp.asarray(np.stack(nxt_list))      # (B, MAX_DISTANCE)

    # Fused path: both models in ONE kernel call (batch-on-lanes layout inside).
    q_model, q_target = agent.forward_both(current_dist, next_dist)
    jax.block_until_ready((q_model, q_target))

    ref_m = ref_mlp(current_dist, next_dist, agent.current_params)
    ref_t = ref_mlp(current_dist, next_dist, agent.target_params)
    np.testing.assert_allclose(np.asarray(q_model), np.asarray(ref_m), rtol=1e-5, atol=1e-5)
    np.testing.assert_allclose(np.asarray(q_target), np.asarray(ref_t), rtol=1e-5, atol=1e-5)
    assert q_model.shape == (B, 1) and q_target.shape == (B, 1)

    # Semantics-preserving forward(action_chooser=...) matches the fused output.
    q_m2 = agent.forward(current_dist, next_dist, action_chooser="model")
    np.testing.assert_allclose(np.asarray(q_m2), np.asarray(q_model), rtol=1e-6, atol=1e-6)
    q_t2 = agent.forward(current_dist, next_dist, action_chooser="target")
    np.testing.assert_allclose(np.asarray(q_t2), np.asarray(q_target), rtol=1e-6, atol=1e-6)

    # Exercise the multi-block grid + padding path:
    # B=300 -> pad to 384 lanes, block_b=128 -> 3 grid steps ("parallel" axis).
    xc2 = jax.random.uniform(jax.random.PRNGKey(1), (300, MAX_DISTANCE), jnp.float32, 0.0, 4.0)
    xn2 = jax.random.uniform(jax.random.PRNGKey(2), (300, MAX_DISTANCE), jnp.float32, 0.0, 4.0)
    q2 = dqn_apply(xc2, xn2, agent._fused, block_b=128)
    jax.block_until_ready(q2)
    np.testing.assert_allclose(np.asarray(q2[:, 0:1]),
                               np.asarray(ref_mlp(xc2, xn2, agent.current_params)),
                               rtol=1e-5, atol=1e-5)
    np.testing.assert_allclose(np.asarray(q2[:, 1:2]),
                               np.asarray(ref_mlp(xc2, xn2, agent.target_params)),
                               rtol=1e-5, atol=1e-5)

    # Fast prepared path: pad/transpose once on host, no copies inside the hot call.
    xc_t, xn_t = prepare_inputs(np.asarray(xc2), np.asarray(xn2))
    q3 = dqn_apply_prepared(xc_t, xn_t, agent._fused)      # (2, 384)
    jax.block_until_ready(q3)
    np.testing.assert_allclose(np.asarray(q3[:, :300].T), np.asarray(q2),
                               rtol=1e-6, atol=1e-6)

    # update_target_model keeps both columns identical (target = copy of current).
    agent.update_target_model()
    qa, qb = agent.forward_both(current_dist, next_dist)
    np.testing.assert_allclose(np.asarray(qa), np.asarray(qb), rtol=1e-6, atol=1e-6)

    print("KERNEL_OK")
</pallas_src>

<mosaic_0001>
module attributes {stable_mosaic.version = 11 : i64} {
  func.func @_dqn_kernel(%arg0: i32, %arg1: memref<8x128xf32, #tpu.memory_space<vmem>>, %arg2: memref<8x128xf32, #tpu.memory_space<vmem>>, %arg3: memref<64x8xf32, #tpu.memory_space<vmem>>, %arg4: memref<64x8xf32, #tpu.memory_space<vmem>>, %arg5: memref<64x1xf32, #tpu.memory_space<vmem>>, %arg6: memref<64x64xf32, #tpu.memory_space<vmem>>, %arg7: memref<64x1xf32, #tpu.memory_space<vmem>>, %arg8: memref<64x64xf32, #tpu.memory_space<vmem>>, %arg9: memref<64x1xf32, #tpu.memory_space<vmem>>, %arg10: memref<2x64xf32, #tpu.memory_space<vmem>>, %arg11: memref<2x1xf32, #tpu.memory_space<vmem>>, %arg12: memref<2x128xf32, #tpu.memory_space<vmem>>) attributes {dimension_semantics = [#tpu.dimension_semantics<parallel>], iteration_bounds = array<i64: 1>, scalar_prefetch = 0 : i64, scratch_operands = 0 : i64, tpu.core_type = #tpu.core_type<tc>, window_params = [{transform_indices = @transform_0, window_bounds = array<i64: 8, 128>}, {transform_indices = @transform_1, window_bounds = array<i64: 8, 128>}, {pipeline_mode = #tpu.pipeline_mode<synchronous>, transform_indices = @transform_2, window_bounds = array<i64: 64, 8>}, {pipeline_mode = #tpu.pipeline_mode<synchronous>, transform_indices = @transform_3, window_bounds = array<i64: 64, 8>}, {pipeline_mode = #tpu.pipeline_mode<synchronous>, transform_indices = @transform_4, window_bounds = array<i64: 64, 1>}, {pipeline_mode = #tpu.pipeline_mode<synchronous>, transform_indices = @transform_5, window_bounds = array<i64: 64, 64>}, {pipeline_mode = #tpu.pipeline_mode<synchronous>, transform_indices = @transform_6, window_bounds = array<i64: 64, 1>}, {pipeline_mode = #tpu.pipeline_mode<synchronous>, transform_indices = @transform_7, window_bounds = array<i64: 64, 64>}, {pipeline_mode = #tpu.pipeline_mode<synchronous>, transform_indices = @transform_8, window_bounds = array<i64: 64, 1>}, {pipeline_mode = #tpu.pipeline_mode<synchronous>, transform_indices = @transform_9, window_bounds = array<i64: 2, 64>}, {pipeline_mode = #tpu.pipeline_mode<synchronous>, transform_indices = @transform_10, window_bounds = array<i64: 2, 1>}, {transform_indices = @transform_11, window_bounds = array<i64: 2, 128>}]} {
    %c0 = arith.constant 0 : index
    %c0_0 = arith.constant 0 : index
    %0 = vector.load %arg1[%c0, %c0_0] : memref<8x128xf32, #tpu.memory_space<vmem>>, vector<8x128xf32>
    %c0_1 = arith.constant 0 : index
    %c0_2 = arith.constant 0 : index
    %1 = vector.load %arg2[%c0_1, %c0_2] : memref<8x128xf32, #tpu.memory_space<vmem>>, vector<8x128xf32>
    %c0_3 = arith.constant 0 : index
    %c0_4 = arith.constant 0 : index
    %2 = vector.load %arg3[%c0_3, %c0_4] : memref<64x8xf32, #tpu.memory_space<vmem>>, vector<64x8xf32>
    %cst = arith.constant dense<0.000000e+00> : vector<64x128xf32>
    %3 = tpu.matmul %2, %0, %cst {dimension_numbers = #tpu.dot_dimension_numbers<[1], [0], [0], [1], [0, 0, 1, 1], [], []>} : vector<64x8xf32>, vector<8x128xf32>, vector<64x128xf32> -> vector<64x128xf32>
    %c0_5 = arith.constant 0 : index
    %c0_6 = arith.constant 0 : index
    %4 = vector.load %arg4[%c0_5, %c0_6] : memref<64x8xf32, #tpu.memory_space<vmem>>, vector<64x8xf32>
    %cst_7 = arith.constant dense<0.000000e+00> : vector<64x128xf32>
    %5 = tpu.matmul %4, %1, %cst_7 {dimension_numbers = #tpu.dot_dimension_numbers<[1], [0], [0], [1], [0, 0, 1, 1], [], []>} : vector<64x8xf32>, vector<8x128xf32>, vector<64x128xf32> -> vector<64x128xf32>
    %6 = arith.addf %3, %5 : vector<64x128xf32>
    %c0_8 = arith.constant 0 : index
    %c0_9 = arith.constant 0 : index
    %7 = vector.load %arg5[%c0_8, %c0_9] : memref<64x1xf32, #tpu.memory_space<vmem>>, vector<64x1xf32>
    %8 = vector.broadcast %7 : vector<64x1xf32> to vector<64x128xf32>
    %9 = arith.addf %6, %8 : vector<64x128xf32>
    %cst_10 = arith.constant 0.000000e+00 : f32
    %10 = vector.broadcast %cst_10 : f32 to vector<64x128xf32>
    %11 = arith.maximumf %9, %10 : vector<64x128xf32>
    %c0_11 = arith.constant 0 : index
    %c0_12 = arith.constant 0 : index
    %12 = vector.load %arg6[%c0_11, %c0_12] : memref<64x64xf32, #tpu.memory_space<vmem>>, vector<64x64xf32>
    %cst_13 = arith.constant dense<0.000000e+00> : vector<64x128xf32>
    %13 = tpu.matmul %12, %11, %cst_13 {dimension_numbers = #tpu.dot_dimension_numbers<[1], [0], [0], [1], [0, 0, 1, 1], [], []>} : vector<64x64xf32>, vector<64x128xf32>, vector<64x128xf32> -> vector<64x128xf32>
    %c0_14 = arith.constant 0 : index
    %c0_15 = arith.constant 0 : index
    %14 = vector.load %arg7[%c0_14, %c0_15] : memref<64x1xf32, #tpu.memory_space<vmem>>, vector<64x1xf32>
    %15 = vector.broadcast %14 : vector<64x1xf32> to vector<64x128xf32>
    %16 = arith.addf %13, %15 : vector<64x128xf32>
    %cst_16 = arith.constant 0.000000e+00 : f32
    %17 = vector.broadcast %cst_16 : f32 to vector<64x128xf32>
    %18 = arith.maximumf %16, %17 : vector<64x128xf32>
    %c0_17 = arith.constant 0 : index
    %c0_18 = arith.constant 0 : index
    %19 = vector.load %arg8[%c0_17, %c0_18] : memref<64x64xf32, #tpu.memory_space<vmem>>, vector<64x64xf32>
    %cst_19 = arith.constant dense<0.000000e+00> : vector<64x128xf32>
    %20 = tpu.matmul %19, %18, %cst_19 {dimension_numbers = #tpu.dot_dimension_numbers<[1], [0], [0], [1], [0, 0, 1, 1], [], []>} : vector<64x64xf32>, vector<64x128xf32>, vector<64x128xf32> -> vector<64x128xf32>
    %c0_20 = arith.constant 0 : index
    %c0_21 = arith.constant 0 : index
    %21 = vector.load %arg9[%c0_20, %c0_21] : memref<64x1xf32, #tpu.memory_space<vmem>>, vector<64x1xf32>
    %22 = vector.broadcast %21 : vector<64x1xf32> to vector<64x128xf32>
    %23 = arith.addf %20, %22 : vector<64x128xf32>
    %cst_22 = arith.constant 0.000000e+00 : f32
    %24 = vector.broadcast %cst_22 : f32 to vector<64x128xf32>
    %25 = arith.maximumf %23, %24 : vector<64x128xf32>
    %c0_23 = arith.constant 0 : index
    %c0_24 = arith.constant 0 : index
    %26 = vector.load %arg10[%c0_23, %c0_24] : memref<2x64xf32, #tpu.memory_space<vmem>>, vector<2x64xf32>
    %cst_25 = arith.constant dense<0.000000e+00> : vector<2x128xf32>
    %27 = tpu.matmul %26, %25, %cst_25 {dimension_numbers = #tpu.dot_dimension_numbers<[1], [0], [0], [1], [0, 0, 1, 1], [], []>} : vector<2x64xf32>, vector<64x128xf32>, vector<2x128xf32> -> vector<2x128xf32>
    %c0_26 = arith.constant 0 : index
    %c0_27 = arith.constant 0 : index
    %28 = vector.load %arg11[%c0_26, %c0_27] : memref<2x1xf32, #tpu.memory_space<vmem>>, vector<2x1xf32>
    %29 = vector.broadcast %28 : vector<2x1xf32> to vector<2x128xf32>
    %30 = arith.addf %27, %29 : vector<2x128xf32>
    %c0_28 = arith.constant 0 : index
    %c0_29 = arith.constant 0 : index
    %31 = vector.load %arg12[%c0_28, %c0_29] : memref<2x128xf32, #tpu.memory_space<vmem>>, vector<2x128xf32>
    tpu.vector_store %arg12[%c0_28, %c0_29], %30 {strides = array<i32>} : memref<2x128xf32, #tpu.memory_space<vmem>>, vector<2x128xf32>,
    return
  }
  func.func @transform_0(%arg0: i32) -> (i32, i32) {
    %c0_i32 = arith.constant 0 : i32
    %c0_i32_0 = arith.constant 0 : i32
    return %c0_i32, %arg0 : i32, i32
  }
  func.func @transform_1(%arg0: i32) -> (i32, i32) {
    %c0_i32 = arith.constant 0 : i32
    %c0_i32_0 = arith.constant 0 : i32
    return %c0_i32, %arg0 : i32, i32
  }
  func.func @transform_2(%arg0: i32) -> (i32, i32) {
    %c0_i32 = arith.constant 0 : i32
    %c0_i32_0 = arith.constant 0 : i32
    %c0_i32_1 = arith.constant 0 : i32
    return %c0_i32, %c0_i32_0 : i32, i32
  }
  func.func @transform_3(%arg0: i32) -> (i32, i32) {
    %c0_i32 = arith.constant 0 : i32
    %c0_i32_0 = arith.constant 0 : i32
    %c0_i32_1 = arith.constant 0 : i32
    return %c0_i32, %c0_i32_0 : i32, i32
  }
  func.func @transform_4(%arg0: i32) -> (i32, i32) {
    %c0_i32 = arith.constant 0 : i32
    %c0_i32_0 = arith.constant 0 : i32
    %c0_i32_1 = arith.constant 0 : i32
    return %c0_i32, %c0_i32_0 : i32, i32
  }
  func.func @transform_5(%arg0: i32) -> (i32, i32) {
    %c0_i32 = arith.constant 0 : i32
    %c0_i32_0 = arith.constant 0 : i32
    %c0_i32_1 = arith.constant 0 : i32
    return %c0_i32, %c0_i32_0 : i32, i32
  }
  func.func @transform_6(%arg0: i32) -> (i32, i32) {
    %c0_i32 = arith.constant 0 : i32
    %c0_i32_0 = arith.constant 0 : i32
    %c0_i32_1 = arith.constant 0 : i32
    return %c0_i32, %c0_i32_0 : i32, i32
  }
  func.func @transform_7(%arg0: i32) -> (i32, i32) {
    %c0_i32 = arith.constant 0 : i32
    %c0_i32_0 = arith.constant 0 : i32
    %c0_i32_1 = arith.constant 0 : i32
    return %c0_i32, %c0_i32_0 : i32, i32
  }
  func.func @transform_8(%arg0: i32) -> (i32, i32) {
    %c0_i32 = arith.constant 0 : i32
    %c0_i32_0 = arith.constant 0 : i32
    %c0_i32_1 = arith.constant 0 : i32
    return %c0_i32, %c0_i32_0 : i32, i32
  }
  func.func @transform_9(%arg0: i32) -> (i32, i32) {
    %c0_i32 = arith.constant 0 : i32
    %c0_i32_0 = arith.constant 0 : i32
    %c0_i32_1 = arith.constant 0 : i32
    return %c0_i32, %c0_i32_0 : i32, i32
  }
  func.func @transform_10(%arg0: i32) -> (i32, i32) {
    %c0_i32 = arith.constant 0 : i32
    %c0_i32_0 = arith.constant 0 : i32
    %c0_i32_1 = arith.constant 0 : i32
    return %c0_i32, %c0_i32_0 : i32, i32
  }
  func.func @transform_11(%arg0: i32) -> (i32, i32) {
    %c0_i32 = arith.constant 0 : i32
    %c0_i32_0 = arith.constant 0 : i32
    return %c0_i32, %arg0 : i32, i32
  }
}

</mosaic_0001>

<bundles_post_ra>
// kernel: dqn_apply.1
= control target key start
LH: loop header
LB: loop body
LE: loop exit
PB: predicated region body
PF: predicated region fallthrough
CT: control target
= control target key end

     0   :  { %v582_v0 = vmov 0   ;;  %vm56_vm0 = vcmask 64512   ;;  %vm307_vm1 = vcmask 523264   ;;  %s859_s4 = inlined_call_operand.vmem [shape: f32[64,1], index: 4, kind: input, shape index: {}]   ;;  %s860_s1 = inlined_call_operand.vmem [shape: f32[8,128], index: 1, kind: input, shape index: {}]   ;;  %s861_s0 = inlined_call_operand.vmem [shape: f32[8,128], index: 0, kind: input, shape index: {}]   ;;  %s862_s3 = inlined_call_operand.vmem [shape: f32[64,8], index: 3, kind: input, shape index: {}]   ;;  %s863_s2 = inlined_call_operand.vmem [shape: f32[64,8], index: 2, kind: input, shape index: {}]   ;;  %s864_s6 = inlined_call_operand.vmem [shape: f32[64,1], index: 6, kind: input, shape index: {}]   ;;  %s865_s8 = inlined_call_operand.vmem [shape: f32[64,1], index: 8, kind: input, shape index: {}]   ;;  %s866_s10 = inlined_call_operand.vmem [shape: f32[2,1], index: 10, kind: input, shape index: {}]   ;;  %s867_s5 = inlined_call_operand.vmem [shape: f32[64,64], index: 5, kind: input, shape index: {}]   ;;  %s868_s7 = inlined_call_operand.vmem [shape: f32[64,64], index: 7, kind: input, shape index: {}]   ;;  %s869_s9 = inlined_call_operand.vmem [shape: f32[2,64], index: 9, kind: input, shape index: {}]   ;;  %s870_s11 = inlined_call_operand.vmem [shape: f32[2,128], index: 11, kind: output, shape index: {}]  }
   0x1   :  { %580 = vset.pattern.permute.xlu1 %v582_v0  ;;  %579 = vset.pattern.permute.xlu0 %v582_v0  ;;  %v194_v1 = vld [vmem:[%s859_s4 + $0x38] sm:$0xff]  ;;  %v192_v2 = vld [vmem:[%s859_s4 + $0x28] sm:$0xff]  ;;  %v39_v3 = vld [vmem:[%s860_s1] sm:$0xff] }
   0x2   :  { %232 = vperm.xlu0 %579, %v194_v1   ;;  %222 = vperm.xlu1 %580, %v192_v2   ;;  %v38_v4 = vld [vmem:[%s861_s0] sm:$0xff]  ;;  %v193_v7 = vld [vmem:[%s859_s4 + $0x30] sm:$0xff]  ;;  %v190_v9 = vld [vmem:[%s859_s4 + $0x18] sm:$0xff] }
   0x3   :  { %v48_v5 = vld [vmem:[%s862_s3] sm:$0xff]  ;;  %96 = vmatpush.msra.mxu0 %v39_v3  ;;  %161 = vmatpush.msra.mxu1 %v38_v4  ;;  %v49_v10 = vld [vmem:[%s862_s3 + $0x8] sm:$0xff]  ;;  %v189_v12 = vld [vmem:[%s859_s4 + $0x10] sm:$0xff] }
   0x4   :  { %v40_v6 = vld [vmem:[%s863_s2] sm:$0xff]  ;;  %545 = vmatmul.msk.f32.vlgmr.msra.gmra.mxu0 %vm56_vm0, %v48_v5  ;;  %581 = vset.pattern.permute.xlu2 %v582_v0  ;;  %v41_v11 = vld [vmem:[%s863_s2 + $0x8] sm:$0xff]  ;;  %v50_v15 = vld [vmem:[%s862_s3 + $0x10] sm:$0xff] }
   0x5   :  { %553 = vmatmul.msk.f32.vlgmr.msra.gmra.mxu1 %vm56_vm0, %v40_v6  ;;  %v191_v8 = vld [vmem:[%s859_s4 + $0x20] sm:$0xff]  ;;  %212 = vperm.xlu2 %581, %v190_v9   ;;  %v188_v13 = vld [vmem:[%s859_s4 + $0x8] sm:$0xff]  ;;  %v42_v16 = vld [vmem:[%s863_s2 + $0x10] sm:$0xff] }
   0x6   :  { %v187_v14 = vld [vmem:[%s859_s4] sm:$0xff]  ;;  %v266_v17 = vld [vmem:[%s864_s6 + $0x38] sm:$0xff]  ;;  %v265_v18 = vld [vmem:[%s864_s6 + $0x30] sm:$0xff] }
   0x7   :  { %v264_v19 = vld [vmem:[%s864_s6 + $0x28] sm:$0xff]  ;;  %v51_v20 = vld [vmem:[%s862_s3 + $0x18] sm:$0xff]  ;;  %v263_v22 = vld [vmem:[%s864_s6 + $0x20] sm:$0xff] }
   0x8   :  { %v43_v21 = vld [vmem:[%s863_s2 + $0x18] sm:$0xff]  ;;  %v261_v24 = vld [vmem:[%s864_s6 + $0x10] sm:$0xff]  ;;  %v52_v25 = vld [vmem:[%s862_s3 + $0x20] sm:$0xff] }
   0x9   :  { %v262_v23 = vld [vmem:[%s864_s6 + $0x18] sm:$0xff]  ;;  %v44_v26 = vld [vmem:[%s863_s2 + $0x20] sm:$0xff]  ;;  %v260_v27 = vld [vmem:[%s864_s6 + $0x8] sm:$0xff] }
   0xa   :  { %227 = vperm.xlu0 %579, %v193_v7   ;;  %217 = vperm.xlu1 %580, %v191_v8   ;;  %v259_v28 = vld [vmem:[%s864_s6] sm:$0xff]  ;;  %v396_v29 = vld [vmem:[%s865_s8 + $0x38] sm:$0xff]  ;;  %v53_v30 = vld [vmem:[%s862_s3 + $0x28] sm:$0xff] }
   0xb   :  { %v45_v31 = vld [vmem:[%s863_s2 + $0x28] sm:$0xff]  ;;  %v395_v32 = vld [vmem:[%s865_s8 + $0x30] sm:$0xff]  ;;  %v393_v34 = vld [vmem:[%s865_s8 + $0x20] sm:$0xff] }
   0xc   :  { %546 = vmatmul.msk.f32.gmra.mxu0 %vm56_vm0, %v49_v10  ;;  %v394_v33 = vld [vmem:[%s865_s8 + $0x28] sm:$0xff]  ;;  %v54_v35 = vld [vmem:[%s862_s3 + $0x30] sm:$0xff]  ;;  %v392_v37 = vld [vmem:[%s865_s8 + $0x18] sm:$0xff] }
   0xd   :  { %554 = vmatmul.msk.f32.gmra.mxu1 %vm56_vm0, %v41_v11  ;;  %207 = vperm.xlu2 %581, %v189_v12   ;;  %v46_v36 = vld [vmem:[%s863_s2 + $0x30] sm:$0xff]  ;;  %v390_v39 = vld [vmem:[%s865_s8 + $0x8] sm:$0xff]  ;;  %v55_v40 = vld [vmem:[%s862_s3 + $0x38] sm:$0xff] }
   0xe   :  { %v391_v38 = vld [vmem:[%s865_s8 + $0x10] sm:$0xff]  ;;  %v47_v41 = vld [vmem:[%s863_s2 + $0x38] sm:$0xff]  ;;  %v389_v42 = vld [vmem:[%s865_s8] sm:$0xff] }
   0xf   :  { %v511_v43 = vld [vmem:[%s866_s10] sm:$0x3] }
  0x12   :  { %202 = vperm.xlu0 %579, %v188_v13   ;;  %197 = vperm.xlu1 %580, %v187_v14  }
  0x14   :  { %547 = vmatmul.msk.f32.gmra.mxu0 %vm56_vm0, %v50_v15 }
  0x15   :  { %555 = vmatmul.msk.f32.gmra.mxu1 %vm56_vm0, %v42_v16  ;;  %304 = vperm.xlu2 %581, %v266_v17  }
  0x1a   :  { %299 = vperm.xlu0 %579, %v265_v18   ;;  %294 = vperm.xlu1 %580, %v264_v19  }
  0x1c   :  { %548 = vmatmul.msk.f32.gmra.mxu0 %vm56_vm0, %v51_v20 }
  0x1d   :  { %556 = vmatmul.msk.f32.gmra.mxu1 %vm56_vm0, %v43_v21  ;;  %289 = vperm.xlu2 %581, %v263_v22  }
  0x22   :  { %284 = vperm.xlu0 %579, %v262_v23   ;;  %279 = vperm.xlu1 %580, %v261_v24  }
  0x24   :  { %549 = vmatmul.msk.f32.gmra.mxu0 %vm56_vm0, %v52_v25 }
  0x25   :  { %557 = vmatmul.msk.f32.gmra.mxu1 %vm56_vm0, %v44_v26  ;;  %274 = vperm.xlu2 %581, %v260_v27  }
  0x2a   :  { %269 = vperm.xlu0 %579, %v259_v28   ;;  %434 = vperm.xlu1 %580, %v396_v29   ;;  %v251_v28 = vld [vmem:[%s867_s5] sm:$0xff]  ;;  %v252_v29 = vld [vmem:[%s867_s5 + $0x8] sm:$0xff] }
  0x2c   :  { %550 = vmatmul.msk.f32.gmra.mxu0 %vm56_vm0, %v53_v30  ;;  %v253_v30 = vld [vmem:[%s867_s5 + $0x10] sm:$0xff] }
  0x2d   :  { %558 = vmatmul.msk.f32.gmra.mxu1 %vm56_vm0, %v45_v31  ;;  %429 = vperm.xlu2 %581, %v395_v32   ;;  %v254_v31 = vld [vmem:[%s867_s5 + $0x18] sm:$0xff]  ;;  %v255_v32 = vld [vmem:[%s867_s5 + $0x20] sm:$0xff] }
  0x32   :  { %424 = vperm.xlu0 %579, %v394_v33   ;;  %419 = vperm.xlu1 %580, %v393_v34   ;;  %v256_v33 = vld [vmem:[%s867_s5 + $0x28] sm:$0xff]  ;;  %v257_v34 = vld [vmem:[%s867_s5 + $0x30] sm:$0xff] }
  0x34   :  { %551 = vmatmul.msk.f32.gmra.mxu0 %vm56_vm0, %v54_v35  ;;  %v258_v35 = vld [vmem:[%s867_s5 + $0x38] sm:$0xff] }
  0x35   :  { %559 = vmatmul.msk.f32.gmra.mxu1 %vm56_vm0, %v46_v36  ;;  %414 = vperm.xlu2 %581, %v392_v37  }
  0x3a   :  { %409 = vperm.xlu0 %579, %v391_v38   ;;  %404 = vperm.xlu1 %580, %v390_v39  }
  0x3c   :  { %552 = vmatmul.msk.f32.gmra.mxu0 %vm56_vm0, %v55_v40 }
  0x3d   :  { %560 = vmatmul.msk.f32.gmra.mxu1 %vm56_vm0, %v47_v41  ;;  %399 = vperm.xlu2 %581, %v389_v42  }
  0x42   :  { %514 = vperm.xlu0 %579, %v511_v43  }
  0x5f   :  { %v213_v61 = vpop.permute.xlu2 %212 }
  0x67   :  { %v208_v17 = vpop.permute.xlu2 %207 }
  0x6f   :  { %v305_v42 = vpop.permute.xlu2 %304 }
  0x74   :  { %v233_v57 = vpop.permute.xlu0 %232  ;;  %v223_v58 = vpop.permute.xlu1 %222 }
  0x7c   :  { %v228_v3 = vpop.permute.xlu0 %227  ;;  %v218_v4 = vpop.permute.xlu1 %217 }
  0x81   :  { %v98_v44 = vpop.f32.mrf.mxu0 }
  0x82   :  { %v163_v45 = vpop.f32.mrf.mxu1 }
  0x83   :  { %v164_v46 = vadd.f32 %v163_v45, %v98_v44 }
  0x84   :  { %v203_v20 = vpop.permute.xlu0 %202  ;;  %v198_v21 = vpop.permute.xlu1 %197 }
  0x85   :  { %v235_v24 = vadd.f32 %v198_v21, %v164_v46  ;;  %v290_v46 = vpop.permute.xlu2 %289 }
  0x87   :  { %v243_v27 = vmax.f32 %v235_v24, 0.0 }
  0x89   :  { %v101_v47 = vpop.f32.mrf.mxu0 }
  0x8a   :  { %v166_v48 = vpop.f32.mrf.mxu1 }
  0x8b   :  { %v167_v14 = vadd.f32 %v166_v48, %v101_v47 }
  0x8c   :  { %v300_v43 = vpop.permute.xlu0 %299  ;;  %v295_v45 = vpop.permute.xlu1 %294 }
  0x8d   :  { %v236_v23 = vadd.f32 %v203_v20, %v167_v14 }
  0x8f   :  { %v244_v26 = vmax.f32 %v236_v23, 0.0 }
  0x91   :  { %v104_v49 = vpop.f32.mrf.mxu0 }
  0x92   :  { %v169_v50 = vpop.f32.mrf.mxu1 }
  0x93   :  { %v170_v11 = vadd.f32 %v169_v50, %v104_v49 }
  0x94   :  { %v285_v50 = vpop.permute.xlu0 %284 }
  0x95   :  { %v237_v19 = vadd.f32 %v208_v17, %v170_v11  ;;  %v388_v11 = vld [vmem:[%s868_s7 + $0x38] sm:$0xff] }
  0x97   :  { %v245_v25 = vmax.f32 %v237_v19, 0.0 }
  0x99   :  { %v107_v51 = vpop.f32.mrf.mxu0 }
  0x9a   :  { %v172_v52 = vpop.f32.mrf.mxu1 }
  0x9b   :  { %v173_v8 = vadd.f32 %v172_v52, %v107_v51 }
  0x9d   :  { %v238_v16 = vadd.f32 %v213_v61, %v173_v8  ;;  %v385_v8 = vld [vmem:[%s868_s7 + $0x20] sm:$0xff] }
  0x9f   :  { %v246_v22 = vmax.f32 %v238_v16, 0.0 }
  0xa1   :  { %v110_v53 = vpop.f32.mrf.mxu0 }
  0xa2   :  { %v175_v54 = vpop.f32.mrf.mxu1 }
  0xa3   :  { %v176_v5 = vadd.f32 %v175_v54, %v110_v53 }
  0xa5   :  { %v239_v13 = vadd.f32 %v218_v4, %v176_v5  ;;  %v381_v4 = vld [vmem:[%s868_s7] sm:$0xff]  ;;  %v382_v5 = vld [vmem:[%s868_s7 + $0x8] sm:$0xff] }
  0xa7   :  { %v247_v18 = vmax.f32 %v239_v13, 0.0 }
  0xa9   :  { %v113_v55 = vpop.f32.mrf.mxu0 }
  0xaa   :  { %v178_v56 = vpop.f32.mrf.mxu1 }
  0xab   :  { %v179_v1 = vadd.f32 %v178_v56, %v113_v55 }
  0xad   :  { %v240_v10 = vadd.f32 %v223_v58, %v179_v1 }
  0xaf   :  { %v248_v15 = vmax.f32 %v240_v10, 0.0  ;;  %v387_v10 = vld [vmem:[%s868_s7 + $0x30] sm:$0xff] }
  0xb1   :  { %v116_v59 = vpop.f32.mrf.mxu0 }
  0xb2   :  { %v181_v60 = vpop.f32.mrf.mxu1 }
  0xb3   :  { %v182_v62 = vadd.f32 %v181_v60, %v116_v59  ;;  %v275_v60 = vpop.permute.xlu2 %274 }
  0xb5   :  { %v241_v7 = vadd.f32 %v228_v3, %v182_v62 }
  0xb7   :  { %v249_v12 = vmax.f32 %v241_v7, 0.0  ;;  %v384_v7 = vld [vmem:[%s868_s7 + $0x18] sm:$0xff] }
  0xb9   :  { %v119_v63 = vpop.f32.mrf.mxu0 }
  0xba   :  { %v184_v0 = vpop.f32.mrf.mxu1 }
  0xbb   :  { %v185_v2 = vadd.f32 %v184_v0, %v119_v63  ;;  %v270_v63 = vpop.permute.xlu0 %269  ;;  %v430_v19 = vpop.permute.xlu2 %429 }
  0xbd   :  { %v242_v6 = vadd.f32 %v233_v57, %v185_v2  ;;  %v280_v57 = vpop.permute.xlu1 %279 }
  0xbf   :  { %v250_v9 = vmax.f32 %v242_v6, 0.0  ;;  %v383_v6 = vld [vmem:[%s868_s7 + $0x10] sm:$0xff] }
  0xc1   :  { %340 = vmatpush.msra.mxu2 %v250_v9  ;;  %v386_v9 = vld [vmem:[%s868_s7 + $0x28] sm:$0xff] }
  0xc3   :  { %341 = vmatpush.msra.mxu2 %v249_v12  ;;  %v425_v21 = vpop.permute.xlu0 %424 }
  0xc5   :  { %342 = vmatpush.msra.mxu2 %v248_v15 }
  0xc7   :  { %343 = vmatpush.msra.mxu2 %v247_v18  ;;  %v435_v18 = vpop.permute.xlu1 %434 }
  0xc9   :  { %344 = vmatpush.msra.mxu2 %v246_v22 }
  0xcb   :  { %345 = vmatpush.msra.mxu2 %v245_v25 }
  0xcd   :  { %346 = vmatpush.msra.mxu2 %v244_v26  ;;  %v415_v26 = vpop.permute.xlu2 %414 }
  0xcf   :  { %347 = vmatpush.msra.mxu2 %v243_v27  ;;  %v420_v22 = vpop.permute.xlu1 %419 }
  0xd0   :  { %561 = vmatmul.msk.f32.vlgmr.msra.gmra.mxu2 %vm307_vm1, %v251_v28 }
  0xd8   :  { %562 = vmatmul.msk.f32.gmra.mxu2 %vm307_vm1, %v252_v29 }
  0xe0   :  { %563 = vmatmul.msk.f32.gmra.mxu2 %vm307_vm1, %v253_v30 }
  0xe8   :  { %564 = vmatmul.msk.f32.gmra.mxu2 %vm307_vm1, %v254_v31 }
  0xf0   :  { %565 = vmatmul.msk.f32.gmra.mxu2 %vm307_vm1, %v255_v32 }
  0xf8   :  { %566 = vmatmul.msk.f32.gmra.mxu2 %vm307_vm1, %v256_v33  ;;  %v410_v33 = vpop.permute.xlu0 %409 }
 0x100   :  { %567 = vmatmul.msk.f32.gmra.mxu2 %vm307_vm1, %v257_v34 }
 0x108   :  { %568 = vmatmul.msk.f32.gmra.mxu2 %vm307_vm1, %v258_v35 }
 0x153   :  { %v349_v36 = vpop.f32.mrf.mxu2 }
 0x154   :  { %v350_v0 = vadd.f32 %v349_v36, %v270_v63  ;;  %v405_v36 = vpop.permute.xlu1 %404 }
 0x156   :  { %v373_v3 = vmax.f32 %v350_v0, 0.0 }
 0x15b   :  { %v352_v37 = vpop.f32.mrf.mxu2 }
 0x15c   :  { %v353_v61 = vadd.f32 %v352_v37, %v275_v60 }
 0x15e   :  { %v374_v2 = vmax.f32 %v353_v61, 0.0 }
 0x163   :  { %v355_v38 = vpop.f32.mrf.mxu2 }
 0x164   :  { %v356_v58 = vadd.f32 %v355_v38, %v280_v57 }
 0x166   :  { %v375_v1 = vmax.f32 %v356_v58, 0.0 }
 0x16b   :  { %v358_v39 = vpop.f32.mrf.mxu2 }
 0x16c   :  { %v359_v55 = vadd.f32 %v358_v39, %v285_v50  ;;  %v400_v39 = vpop.permute.xlu2 %399 }
 0x16e   :  { %v376_v62 = vmax.f32 %v359_v55, 0.0 }
 0x173   :  { %v361_v40 = vpop.f32.mrf.mxu2 }
 0x174   :  { %v362_v53 = vadd.f32 %v361_v40, %v290_v46 }
 0x176   :  { %v377_v59 = vmax.f32 %v362_v53, 0.0 }
 0x17b   :  { %v364_v41 = vpop.f32.mrf.mxu2 }
 0x17c   :  { %v365_v51 = vadd.f32 %v364_v41, %v295_v45  ;;  %v515_v45 = vpop.permute.xlu0 %514 }
 0x17e   :  { %v378_v56 = vmax.f32 %v365_v51, 0.0 }
 0x183   :  { %v367_v44 = vpop.f32.mrf.mxu2 }
 0x184   :  { %v368_v48 = vadd.f32 %v367_v44, %v300_v43  ;;  %v510_v44 = vld [vmem:[%s869_s9] sm:$0x3] }
 0x186   :  { %v379_v54 = vmax.f32 %v368_v48, 0.0 }
 0x18b   :  { %v370_v47 = vpop.f32.mrf.mxu2 }
 0x18c   :  { %v371_v49 = vadd.f32 %v370_v47, %v305_v42 }
 0x18e   :  { %v380_v52 = vmax.f32 %v371_v49, 0.0 }
 0x190   :  { %469 = vmatpush.msra.mxu3 %v380_v52 }
 0x192   :  { %470 = vmatpush.msra.mxu3 %v379_v54 }
 0x194   :  { %471 = vmatpush.msra.mxu3 %v378_v56 }
 0x196   :  { %472 = vmatpush.msra.mxu3 %v377_v59 }
 0x198   :  { %473 = vmatpush.msra.mxu3 %v376_v62 }
 0x19a   :  { %474 = vmatpush.msra.mxu3 %v375_v1 }
 0x19c   :  { %475 = vmatpush.msra.mxu3 %v374_v2 }
 0x19e   :  { %476 = vmatpush.msra.mxu3 %v373_v3 }
 0x19f   :  { %569 = vmatmul.msk.f32.vlgmr.msra.gmra.mxu3 %vm307_vm1, %v381_v4 }
 0x1a7   :  { %570 = vmatmul.msk.f32.gmra.mxu3 %vm307_vm1, %v382_v5 }
 0x1af   :  { %571 = vmatmul.msk.f32.gmra.mxu3 %vm307_vm1, %v383_v6 }
 0x1b7   :  { %572 = vmatmul.msk.f32.gmra.mxu3 %vm307_vm1, %v384_v7 }
 0x1bf   :  { %573 = vmatmul.msk.f32.gmra.mxu3 %vm307_vm1, %v385_v8 }
 0x1c7   :  { %574 = vmatmul.msk.f32.gmra.mxu3 %vm307_vm1, %v386_v9 }
 0x1cf   :  { %575 = vmatmul.msk.f32.gmra.mxu3 %vm307_vm1, %v387_v10 }
 0x1d7   :  { %576 = vmatmul.msk.f32.gmra.mxu3 %vm307_vm1, %v388_v11 }
 0x222   :  { %v478_v12 = vpop.f32.mrf.mxu3 }
 0x223   :  { %v479_v40 = vadd.f32 %v478_v12, %v400_v39 }
 0x225   :  { %v502_v43 = vmax.f32 %v479_v40, 0.0 }
 0x22a   :  { %v481_v13 = vpop.f32.mrf.mxu3 }
 0x22b   :  { %v482_v37 = vadd.f32 %v481_v13, %v405_v36 }
 0x22d   :  { %v503_v42 = vmax.f32 %v482_v37, 0.0 }
 0x232   :  { %v484_v14 = vpop.f32.mrf.mxu3 }
 0x233   :  { %v485_v34 = vadd.f32 %v484_v14, %v410_v33 }
 0x235   :  { %v504_v41 = vmax.f32 %v485_v34, 0.0 }
 0x23a   :  { %v487_v15 = vpop.f32.mrf.mxu3 }
 0x23b   :  { %v488_v31 = vadd.f32 %v487_v15, %v415_v26 }
 0x23d   :  { %v505_v38 = vmax.f32 %v488_v31, 0.0 }
 0x242   :  { %v490_v16 = vpop.f32.mrf.mxu3 }
 0x243   :  { %v491_v29 = vadd.f32 %v490_v16, %v420_v22 }
 0x245   :  { %v506_v35 = vmax.f32 %v491_v29, 0.0 }
 0x24a   :  { %v493_v17 = vpop.f32.mrf.mxu3 }
 0x24b   :  { %v494_v27 = vadd.f32 %v493_v17, %v425_v21 }
 0x24d   :  { %v507_v32 = vmax.f32 %v494_v27, 0.0 }
 0x252   :  { %v496_v20 = vpop.f32.mrf.mxu3 }
 0x253   :  { %v497_v24 = vadd.f32 %v496_v20, %v430_v19 }
 0x255   :  { %v508_v30 = vmax.f32 %v497_v24, 0.0 }
 0x25a   :  { %v499_v23 = vpop.f32.mrf.mxu3 }
 0x25b   :  { %v500_v25 = vadd.f32 %v499_v23, %v435_v18 }
 0x25d   :  { %v509_v28 = vmax.f32 %v500_v25, 0.0 }
 0x25f   :  { %528 = vmatpush.msrb.mxu0 %v509_v28 }
 0x261   :  { %529 = vmatpush.msrb.mxu0 %v508_v30 }
 0x263   :  { %530 = vmatpush.msrb.mxu0 %v507_v32 }
 0x265   :  { %531 = vmatpush.msrb.mxu0 %v506_v35 }
 0x267   :  { %532 = vmatpush.msrb.mxu0 %v505_v38 }
 0x269   :  { %533 = vmatpush.msrb.mxu0 %v504_v41 }
 0x26b   :  { %534 = vmatpush.msrb.mxu0 %v503_v42 }
 0x26d   :  { %535 = vmatpush.msrb.mxu0 %v502_v43 }
 0x26e   :  { %577 = vmatmul.msk.f32.vlgmr.msrb.gmra.mxu0 %vm307_vm1, %v510_v44 }
 0x2eb   :  { %v537_v46 = vpop.f32.mrf.mxu0 }
 0x2ec   :  { %v538_v47 = vadd.f32 %v537_v46, %v515_v45 }
 0x2ee   :  { %540 = vst [vmem:[%s870_s11] sm:$0x3] %v538_v47 }

</bundles_post_ra>
